<compile_context>
chip_gen: v6e
topology: v6e:2x2x1
jax: 0.10.0
libtpu: 0.0.40
codegen_flags: <defaults>
</compile_context>

<pallas_src>
import dataclasses

import jax
import jax.numpy as jnp
from jax.experimental import pallas as pl
from jax.experimental.pallas import tpu as pltpu


def _round_up(n: int, m: int) -> int:
    return ((n + m - 1) // m) * m


def _cdiv(a: int, b: int) -> int:
    return (a + b - 1) // b


def _tpu_generation() -> int:
    """Best-effort TPU generation sniff (falls back to v6e-style defaults)."""
    try:
        kind = jax.devices()[0].device_kind.lower()
    except Exception:  # pragma: no cover - defensive
        return 6
    if "v7" in kind or "tpu7" in kind or "7x" in kind:
        return 7
    if "v6" in kind:
        return 6
    if "v5" in kind:
        return 5
    if "v4" in kind:
        return 4
    return 6


# gen -> (tm_max, th, vmem_cap_bytes, force_two_row_tiles)
#   v7x: 64 MiB VMEM, 2 TensorCores -> keep working set < ~56 MiB and make
#        sure the parallel M axis has >= 2 tiles.
#   v6e: 128 MiB VMEM, highest compute/BW knee (~656 FLOP/B) -> go big on tm.
#   v5e: 128 MiB physical VMEM; bf16 params recommended (see module docstring).
_TILE_CFG = {
    7: (512, 512, 56 << 20, True),
    6: (1024, 512, 100 << 20, False),
    5: (512, 512, 100 << 20, False),
    4: (512, 512, 100 << 20, False),
}


@dataclasses.dataclass(frozen=True)
class SwiGLUParams:
    """Weights padded once (lane-dense) at init time; reused every call."""
    w1: jax.Array   # [d_in_pad, h_pad]
    b1: jax.Array   # [1, h_pad]
    w2: jax.Array   # [d_in_pad, h_pad]
    b2: jax.Array   # [1, h_pad]
    wo: jax.Array   # [h_pad, d_out_pad]
    bo: jax.Array   # [1, d_out_pad]
    d_in: int
    hidden: int
    d_out: int
    d_in_pad: int
    h_pad: int
    d_out_pad: int
    th: int         # hidden-chunk width the padding was derived for


def prepare_swiglu_params(w1, b1, w2, b2, wo, bo, *, th=None, dtype=None):
    """Pad (and optionally cast) the SwiGLU weights once, outside the hot path.

    w1, w2: [d_in, hidden]; wo: [hidden, d_out]; biases: [hidden]/[1,hidden]
    and [d_out]/[1,d_out].  Zero padding of d_in / hidden / d_out contributes
    exactly zero to every dot product, so the math is unchanged.
    """
    d_in, hidden = w1.shape
    d_out = wo.shape[1]

    gen = _tpu_generation()
    if th is None:
        th = _TILE_CFG.get(gen, _TILE_CFG[6])[1]

    d_in_pad = _round_up(d_in, 128)
    d_out_pad = _round_up(d_out, 128)
    th_eff = min(th, _round_up(hidden, 128))
    h_pad = _round_up(hidden, th_eff)

    def cast(a):
        return a if dtype is None else a.astype(dtype)

    def pad2(a, rows, cols):
        a = cast(jnp.asarray(a))
        return jnp.pad(a, ((0, rows - a.shape[0]), (0, cols - a.shape[1])))

    def padb(b, cols):
        b = cast(jnp.asarray(b).reshape(1, -1))
        return jnp.pad(b, ((0, 0), (0, cols - b.shape[1])))

    return SwiGLUParams(
        w1=pad2(w1, d_in_pad, h_pad), b1=padb(b1, h_pad),
        w2=pad2(w2, d_in_pad, h_pad), b2=padb(b2, h_pad),
        wo=pad2(wo, h_pad, d_out_pad), bo=padb(bo, d_out_pad),
        d_in=d_in, hidden=hidden, d_out=d_out,
        d_in_pad=d_in_pad, h_pad=h_pad, d_out_pad=d_out_pad, th=th_eff,
    )


def swiglu_kernel(x_ref, w1_ref, b1_ref, w2_ref, b2_ref, wo_ref, bo_ref,
                  o_ref, acc_ref):
    k = pl.program_id(1)

    # Initialize the f32 accumulator with the output bias on the first
    # hidden chunk of each row tile.
    @pl.when(k == 0)
    def _():
        acc_ref[...] = jnp.broadcast_to(
            bo_ref[...].astype(jnp.float32), acc_ref.shape)

    x = x_ref[...]                                            # (tm, d_in_pad)

    # fc1 / fc2 for this hidden chunk (f32 accumulation on the MXU).
    h1 = jnp.dot(x, w1_ref[...], preferred_element_type=jnp.float32)
    h1 = h1 + b1_ref[...].astype(jnp.float32)
    h2 = jnp.dot(x, w2_ref[...], preferred_element_type=jnp.float32)
    h2 = h2 + b2_ref[...].astype(jnp.float32)

    # SiLU(h1) * h2 in f32 (sigmoid's exp lands on the EUP slot).
    g = h1 * jax.nn.sigmoid(h1) * h2                          # (tm, th)

    # Partial output projection: accumulate g_chunk @ Wo_chunk.
    # Note: g is cast to the weight dtype, so a bf16 parameter set gets a
    # bf16 round-trip on the gated activations (expected for bf16 MXU use).
    acc_ref[...] += jnp.dot(g.astype(wo_ref.dtype), wo_ref[...],
                            preferred_element_type=jnp.float32)

    # Write back once all hidden chunks have been accumulated.
    @pl.when(k == pl.num_programs(1) - 1)
    def _():
        o_ref[...] = acc_ref[...].astype(o_ref.dtype)


def swiglu(x, params: SwiGLUParams, *, tm=None):
    """x: [M, d_in] activations; params: output of prepare_swiglu_params."""
    M, d_in = x.shape
    assert d_in == params.d_in, "input feature dim mismatch"
    dtype = x.dtype

    d_in_pad = params.d_in_pad
    h_pad = params.h_pad
    d_out_pad = params.d_out_pad
    th_eff = params.th

    gen = _tpu_generation()
    tm_max, _, vmem_cap, want_two_tiles = _TILE_CFG.get(gen, _TILE_CFG[6])
    if tm is not None:
        tm_max = tm

    sub = 16 if dtype == jnp.bfloat16 else 8
    itemsize_x = jnp.dtype(dtype).itemsize
    itemsize_w = jnp.dtype(params.w1.dtype).itemsize

    # Double-buffered per-step working set for a given row tile.
    def working_set(tm_):
        x_buf = 2 * tm_ * d_in_pad * itemsize_x                       # x tile
        w_buf = 2 * (2 * d_in_pad * th_eff + th_eff * d_out_pad) * itemsize_w
        b_buf = 2 * (2 * th_eff + d_out_pad) * itemsize_w             # biases
        o_buf = 2 * tm_ * d_out_pad * itemsize_x                      # out tile
        acc_buf = tm_ * d_out_pad * 4                                 # f32 acc
        return x_buf + w_buf + b_buf + o_buf + acc_buf

    # Shrink tm if the working set would blow the per-generation VMEM cap.
    while working_set(tm_max) > int(vmem_cap * 0.85) and tm_max > 2 * sub:
        tm_max //= 2

    # Divisor-friendly row tile: last tile wastes < one sublane group instead
    # of being mostly padding.
    n_tiles = max(1, _cdiv(M, tm_max))
    if want_two_tiles and n_tiles == 1 and _round_up(M, sub) >= 2 * sub:
        n_tiles = 2  # v7x: give the second TensorCore a row tile to chew on.
    tm_eff = _round_up(_cdiv(M, n_tiles), sub)
    m_pad = n_tiles * tm_eff

    # Explicit scoped-VMEM budget (default limits are too small at realistic
    # shapes); ~20% headroom over the actual working set, floor 32 MiB.
    vmem_limit = min(vmem_cap,
                     max(32 << 20, int(working_set(tm_eff) * 1.2) + (1 << 20)))

    # Pad activations only (weights were padded once at init).
    if m_pad != M or d_in_pad != d_in:
        xp = jnp.pad(x, ((0, m_pad - M), (0, d_in_pad - d_in)))
    else:
        xp = x

    grid = (n_tiles, h_pad // th_eff)

    # Weights are re-streamed from HBM once per row tile; count that.
    w_bytes = (params.w1.size + params.w2.size + params.wo.size) * itemsize_w
    b_bytes = (params.b1.size + params.b2.size + params.bo.size) * itemsize_w
    cost = pl.CostEstimate(
        flops=2 * m_pad * (2 * d_in_pad * h_pad + h_pad * d_out_pad),
        transcendentals=m_pad * h_pad,
        bytes_accessed=(n_tiles * (w_bytes + b_bytes)
                        + m_pad * d_in_pad * itemsize_x
                        + m_pad * d_out_pad * itemsize_x),
    )

    out = pl.pallas_call(
        swiglu_kernel,
        out_shape=jax.ShapeDtypeStruct((m_pad, d_out_pad), dtype),
        grid_spec=pltpu.PrefetchScalarGridSpec(
            num_scalar_prefetch=0,
            grid=grid,
            in_specs=[
                pl.BlockSpec((tm_eff, d_in_pad), lambda i, k: (i, 0)),   # x tile (resident over k)
                pl.BlockSpec((d_in_pad, th_eff), lambda i, k: (0, k)),   # W1 chunk (streamed)
                pl.BlockSpec((1, th_eff), lambda i, k: (0, k)),          # b1 chunk
                pl.BlockSpec((d_in_pad, th_eff), lambda i, k: (0, k)),   # W2 chunk (streamed)
                pl.BlockSpec((1, th_eff), lambda i, k: (0, k)),          # b2 chunk
                pl.BlockSpec((th_eff, d_out_pad), lambda i, k: (k, 0)),  # Wo chunk (streamed)
                pl.BlockSpec((1, d_out_pad), lambda i, k: (0, 0)),       # bo (resident)
            ],
            out_specs=pl.BlockSpec((tm_eff, d_out_pad), lambda i, k: (i, 0)),
            scratch_shapes=[pltpu.VMEM((tm_eff, d_out_pad), jnp.float32)],
        ),
        compiler_params=pltpu.CompilerParams(
            dimension_semantics=("parallel", "arbitrary"),
            vmem_limit_bytes=vmem_limit,
        ),
        cost_estimate=cost,
    )(xp, params.w1, params.b1, params.w2, params.b2, params.wo, params.bo)

    # Strip padding.
    return out[:M, :params.d_out]


def swiglu_ref(x, w1, b1, w2, b2, wo, bo):
    h1 = x @ w1 + b1
    h2 = x @ w2 + b2
    return (h1 * jax.nn.sigmoid(h1) * h2) @ wo + bo


if __name__ == "__main__":
    # Small shapes consistent with the module: batch=2, seq=8,
    # input_dim=32, hidden_dim=64, out_dim=32.
    batch, seq = 2, 8
    input_dim, hidden_dim, out_dim = 32, 64, 32

    key = jax.random.PRNGKey(0)
    kx, k1, kb1, k2, kb2, ko, kbo = jax.random.split(key, 7)

    x = jax.random.normal(kx, (batch, seq, input_dim), dtype=jnp.float32)

    # Deterministic parameter init (Linear weights stored as [in, out]).
    w1 = jax.random.normal(k1, (input_dim, hidden_dim), dtype=jnp.float32) * 0.1
    b1 = jax.random.normal(kb1, (1, hidden_dim), dtype=jnp.float32) * 0.1
    w2 = jax.random.normal(k2, (input_dim, hidden_dim), dtype=jnp.float32) * 0.1
    b2 = jax.random.normal(kb2, (1, hidden_dim), dtype=jnp.float32) * 0.1
    wo = jax.random.normal(ko, (hidden_dim, out_dim), dtype=jnp.float32) * 0.1
    bo = jax.random.normal(kbo, (1, out_dim), dtype=jnp.float32) * 0.1

    # Pad/cast weights ONCE (outside the per-call path).  For v5e-style
    # deployments pass dtype=jnp.bfloat16 here and feed bf16 activations.
    params = prepare_swiglu_params(w1, b1, w2, b2, wo, bo)

    x2d = x.reshape(batch * seq, input_dim)

    out2d = swiglu(x2d, params)
    out = out2d.reshape(batch, seq, out_dim)
    jax.block_until_ready(out)

    ref = swiglu_ref(x2d, w1, b1, w2, b2, wo, bo).reshape(batch, seq, out_dim)
    assert jnp.allclose(out, ref, atol=1e-4, rtol=1e-4), "mismatch vs reference"

    print("KERNEL_OK")
</pallas_src>

<mosaic_0001>
module attributes {stable_mosaic.version = 11 : i64} {
  func.func @swiglu_kernel(%arg0: i32, %arg1: i32, %arg2: memref<16x128xf32, #tpu.memory_space<vmem>>, %arg3: memref<128x128xf32, #tpu.memory_space<vmem>>, %arg4: memref<1x128xf32, #tpu.memory_space<vmem>>, %arg5: memref<128x128xf32, #tpu.memory_space<vmem>>, %arg6: memref<1x128xf32, #tpu.memory_space<vmem>>, %arg7: memref<128x128xf32, #tpu.memory_space<vmem>>, %arg8: memref<1x128xf32, #tpu.memory_space<vmem>>, %arg9: memref<16x128xf32, #tpu.memory_space<vmem>>, %arg10: memref<16x128xf32, #tpu.memory_space<vmem>>) attributes {dimension_semantics = [#tpu.dimension_semantics<parallel>, #tpu.dimension_semantics<arbitrary>], iteration_bounds = array<i64: 1, 1>, scalar_prefetch = 0 : i64, scratch_operands = 1 : i64, tpu.core_type = #tpu.core_type<tc>, window_params = [{transform_indices = @transform_0, window_bounds = array<i64: 16, 128>}, {transform_indices = @transform_1, window_bounds = array<i64: 128, 128>}, {transform_indices = @transform_2, window_bounds = array<i64: 1, 128>}, {transform_indices = @transform_3, window_bounds = array<i64: 128, 128>}, {transform_indices = @transform_4, window_bounds = array<i64: 1, 128>}, {transform_indices = @transform_5, window_bounds = array<i64: 128, 128>}, {pipeline_mode = #tpu.pipeline_mode<synchronous>, transform_indices = @transform_6, window_bounds = array<i64: 1, 128>}, {transform_indices = @transform_7, window_bounds = array<i64: 16, 128>}]} {
    %c0_i32 = arith.constant 0 : i32
    %0 = arith.cmpi eq, %arg1, %c0_i32 : i32
    %1 = arith.extui %0 : i1 to i32
    %c0_i32_0 = arith.constant 0 : i32
    %2 = arith.cmpi ne, %1, %c0_i32_0 : i32
    scf.if %2 {
      %c0_21 = arith.constant 0 : index
      %c0_22 = arith.constant 0 : index
      %29 = vector.load %arg8[%c0_21, %c0_22] : memref<1x128xf32, #tpu.memory_space<vmem>>, vector<1x128xf32>
      %30 = vector.shape_cast %29 : vector<1x128xf32> to vector<1x128xf32>
      %31 = vector.broadcast %30 : vector<1x128xf32> to vector<16x128xf32>
      %c0_23 = arith.constant 0 : index
      %c0_24 = arith.constant 0 : index
      %32 = vector.load %arg10[%c0_23, %c0_24] : memref<16x128xf32, #tpu.memory_space<vmem>>, vector<16x128xf32>
      tpu.vector_store %arg10[%c0_23, %c0_24], %31 {strides = array<i32>} : memref<16x128xf32, #tpu.memory_space<vmem>>, vector<16x128xf32>,
    } else {
    }
    %c0 = arith.constant 0 : index
    %c0_1 = arith.constant 0 : index
    %3 = vector.load %arg2[%c0, %c0_1] : memref<16x128xf32, #tpu.memory_space<vmem>>, vector<16x128xf32>
    %c0_2 = arith.constant 0 : index
    %c0_3 = arith.constant 0 : index
    %4 = vector.load %arg3[%c0_2, %c0_3] : memref<128x128xf32, #tpu.memory_space<vmem>>, vector<128x128xf32>
    %cst = arith.constant dense<0.000000e+00> : vector<16x128xf32>
    %5 = tpu.matmul %3, %4, %cst {dimension_numbers = #tpu.dot_dimension_numbers<[1], [0], [0], [1], [0, 0, 1, 1], [], []>} : vector<16x128xf32>, vector<128x128xf32>, vector<16x128xf32> -> vector<16x128xf32>
    %c0_4 = arith.constant 0 : index
    %c0_5 = arith.constant 0 : index
    %6 = vector.load %arg4[%c0_4, %c0_5] : memref<1x128xf32, #tpu.memory_space<vmem>>, vector<1x128xf32>
    %7 = vector.broadcast %6 : vector<1x128xf32> to vector<16x128xf32>
    %8 = arith.addf %5, %7 : vector<16x128xf32>
    %c0_6 = arith.constant 0 : index
    %c0_7 = arith.constant 0 : index
    %9 = vector.load %arg5[%c0_6, %c0_7] : memref<128x128xf32, #tpu.memory_space<vmem>>, vector<128x128xf32>
    %cst_8 = arith.constant dense<0.000000e+00> : vector<16x128xf32>
    %10 = tpu.matmul %3, %9, %cst_8 {dimension_numbers = #tpu.dot_dimension_numbers<[1], [0], [0], [1], [0, 0, 1, 1], [], []>} : vector<16x128xf32>, vector<128x128xf32>, vector<16x128xf32> -> vector<16x128xf32>
    %c0_9 = arith.constant 0 : index
    %c0_10 = arith.constant 0 : index
    %11 = vector.load %arg6[%c0_9, %c0_10] : memref<1x128xf32, #tpu.memory_space<vmem>>, vector<1x128xf32>
    %12 = vector.broadcast %11 : vector<1x128xf32> to vector<16x128xf32>
    %13 = arith.addf %10, %12 : vector<16x128xf32>
    %14 = arith.negf %8 : vector<16x128xf32>
    %15 = math.exp %14 : vector<16x128xf32>
    %cst_11 = arith.constant 1.000000e+00 : f32
    %16 = vector.broadcast %cst_11 : f32 to vector<16x128xf32>
    %17 = arith.addf %16, %15 : vector<16x128xf32>
    %18 = arith.divf %16, %17 : vector<16x128xf32>
    %19 = arith.mulf %8, %18 : vector<16x128xf32>
    %20 = arith.mulf %19, %13 : vector<16x128xf32>
    %c0_12 = arith.constant 0 : index
    %c0_13 = arith.constant 0 : index
    %21 = vector.load %arg10[%c0_12, %c0_13] : memref<16x128xf32, #tpu.memory_space<vmem>>, vector<16x128xf32>
    %c0_14 = arith.constant 0 : index
    %c0_15 = arith.constant 0 : index
    %22 = vector.load %arg7[%c0_14, %c0_15] : memref<128x128xf32, #tpu.memory_space<vmem>>, vector<128x128xf32>
    %cst_16 = arith.constant dense<0.000000e+00> : vector<16x128xf32>
    %23 = tpu.matmul %20, %22, %cst_16 {dimension_numbers = #tpu.dot_dimension_numbers<[1], [0], [0], [1], [0, 0, 1, 1], [], []>} : vector<16x128xf32>, vector<128x128xf32>, vector<16x128xf32> -> vector<16x128xf32>
    %24 = arith.addf %21, %23 : vector<16x128xf32>
    %c0_17 = arith.constant 0 : index
    %c0_18 = arith.constant 0 : index
    %25 = vector.load %arg10[%c0_17, %c0_18] : memref<16x128xf32, #tpu.memory_space<vmem>>, vector<16x128xf32>
    tpu.vector_store %arg10[%c0_17, %c0_18], %24 {strides = array<i32>} : memref<16x128xf32, #tpu.memory_space<vmem>>, vector<16x128xf32>,
    %c0_i32_19 = arith.constant 0 : i32
    %26 = arith.cmpi eq, %arg1, %c0_i32_19 : i32
    %27 = arith.extui %26 : i1 to i32
    %c0_i32_20 = arith.constant 0 : i32
    %28 = arith.cmpi ne, %27, %c0_i32_20 : i32
    scf.if %28 {
      %c0_21 = arith.constant 0 : index
      %c0_22 = arith.constant 0 : index
      %29 = vector.load %arg10[%c0_21, %c0_22] : memref<16x128xf32, #tpu.memory_space<vmem>>, vector<16x128xf32>
      %c0_23 = arith.constant 0 : index
      %c0_24 = arith.constant 0 : index
      %30 = vector.load %arg9[%c0_23, %c0_24] : memref<16x128xf32, #tpu.memory_space<vmem>>, vector<16x128xf32>
      tpu.vector_store %arg9[%c0_23, %c0_24], %29 {strides = array<i32>} : memref<16x128xf32, #tpu.memory_space<vmem>>, vector<16x128xf32>,
    } else {
    }
    return
  }
  func.func @transform_0(%arg0: i32, %arg1: i32) -> (i32, i32) {
    %c0_i32 = arith.constant 0 : i32
    %c0_i32_0 = arith.constant 0 : i32
    return %arg0, %c0_i32 : i32, i32
  }
  func.func @transform_1(%arg0: i32, %arg1: i32) -> (i32, i32) {
    %c0_i32 = arith.constant 0 : i32
    %c0_i32_0 = arith.constant 0 : i32
    return %c0_i32, %arg1 : i32, i32
  }
  func.func @transform_2(%arg0: i32, %arg1: i32) -> (i32, i32) {
    %c0_i32 = arith.constant 0 : i32
    %c0_i32_0 = arith.constant 0 : i32
    return %c0_i32, %arg1 : i32, i32
  }
  func.func @transform_3(%arg0: i32, %arg1: i32) -> (i32, i32) {
    %c0_i32 = arith.constant 0 : i32
    %c0_i32_0 = arith.constant 0 : i32
    return %c0_i32, %arg1 : i32, i32
  }
  func.func @transform_4(%arg0: i32, %arg1: i32) -> (i32, i32) {
    %c0_i32 = arith.constant 0 : i32
    %c0_i32_0 = arith.constant 0 : i32
    return %c0_i32, %arg1 : i32, i32
  }
  func.func @transform_5(%arg0: i32, %arg1: i32) -> (i32, i32) {
    %c0_i32 = arith.constant 0 : i32
    %c0_i32_0 = arith.constant 0 : i32
    return %arg1, %c0_i32 : i32, i32
  }
  func.func @transform_6(%arg0: i32, %arg1: i32) -> (i32, i32) {
    %c0_i32 = arith.constant 0 : i32
    %c0_i32_0 = arith.constant 0 : i32
    %c0_i32_1 = arith.constant 0 : i32
    return %c0_i32, %c0_i32_0 : i32, i32
  }
  func.func @transform_7(%arg0: i32, %arg1: i32) -> (i32, i32) {
    %c0_i32 = arith.constant 0 : i32
    %c0_i32_0 = arith.constant 0 : i32
    return %arg0, %c0_i32 : i32, i32
  }
}

</mosaic_0001>

<bundles_post_ra>
// kernel: tpu_custom_call.1
= control target key start
LH: loop header
LB: loop body
LE: loop exit
PB: predicated region body
PF: predicated region fallthrough
CT: control target
= control target key end

     0   :  { %12 = vsyncpa [#allocation4], 0  ;;  %s809_s0 = inlined_call_operand.hbm [shape: f32[16,128], index: 0, kind: input, shape index: {}]   ;;  %s810_s1 = inlined_call_operand.hbm [shape: f32[128,128], index: 1, kind: input, shape index: {}]   ;;  %s811_s2 = inlined_call_operand.vmem [shape: f32[1,128], index: 2, kind: input, shape index: {}]   ;;  %s812_s3 = inlined_call_operand.hbm [shape: f32[128,128], index: 3, kind: input, shape index: {}]   ;;  %s813_s4 = inlined_call_operand.vmem [shape: f32[1,128], index: 4, kind: input, shape index: {}]   ;;  %s814_s5 = inlined_call_operand.hbm [shape: f32[128,128], index: 5, kind: input, shape index: {}]   ;;  %s815_s6 = inlined_call_operand.vmem [shape: f32[1,128], index: 6, kind: input, shape index: {}]   ;;  %s816_s7 = inlined_call_operand.hbm [shape: f32[16,128], index: 7, kind: output, shape index: {}]  }
   0x1   :  { %13 = vsyncpa [#allocation7], 0 }
   0x2   :  { %14 = vsyncpa [#allocation10], 0 }
   0x3   :  { %15 = vsyncpa [#allocation5], 0  ;;  %s719_s24 = smov [#allocation6]   ;;  %s720_s26 = smov [#allocation3]  }
   0x4   :  { %s33_s25 = sshll.u32 %s719_s24, 4  ;;  %s21_s27 = sshll.u32 %s720_s26, 4  ;;  %s34_s25 = int_to_ptr.vmem [resolvable:$true] %s33_s25  ;;  %s22_s27 = int_to_ptr.vmem [resolvable:$true] %s21_s27 }
   0x5   :  { %s619_s28 = scalar_lea.vmem %s34_s25, 2048  ;;  %p624_p1 = scmp.lt.s32.totalorder %s34_s25, %s34_s25 }
   0x6   :  { %p620_p0 = scmp.ne.s32.totalorder %s34_s25, %s619_s28  ;;  %p625_p2 = scmp.lt.s32.totalorder %s619_s28, %s619_s28 }
   0x8   :  { %p626_p3 = por %p625_p2, %p624_p1 }
   0xa   :  { %p627_p4 = pnand %p626_p3, %p620_p0 }
   0xc   :  { %630 = shalt.err (!%p627_p4)
}
   0xd   :  { %s721_s29 = smov 128   ;;  %s722_s30 = smov 8  }
   0xe   :  { %39 = dma.hbm_to_vmem [thread:$0]  %s810_s1, 2048, %s34_s25, [#allocation7], %s721_s29, %s721_s29, %s722_s30  }
   0xf   :  { %s639_s10 = scalar_lea.vmem %s22_s27, 256  ;;  %p644_p6 = scmp.lt.s32.totalorder %s22_s27, %s22_s27 }
  0x10   :  { %p640_p5 = scmp.ne.s32.totalorder %s22_s27, %s639_s10  ;;  %p645_p7 = scmp.lt.s32.totalorder %s639_s10, %s639_s10 }
  0x12   :  { %p646_p8 = por %p645_p7, %p644_p6 }
  0x14   :  { %p647_p9 = pnand %p646_p8, %p640_p5 }
  0x16   :  { %650 = shalt.err (!%p647_p9)
}
  0x17   :  { %27 = dma.hbm_to_vmem [thread:$0]  %s809_s0, 256, %s22_s27, [#allocation4], %s721_s29, %s721_s29, %s722_s30  }
  0x18   :  { %s723_s13 = smov [#allocation8]   ;;  %s724_s15 = smov [#allocation9]  }
  0x19   :  { %s47_s14 = sshll.u32 %s723_s13, 4  ;;  %s61_s16 = sshll.u32 %s724_s15, 4  ;;  %s48_s14 = int_to_ptr.vmem [resolvable:$true] %s47_s14  ;;  %s62_s16 = int_to_ptr.vmem [resolvable:$true] %s61_s16 }
  0x1a   :  { %s659_s1 = scalar_lea.vmem %s48_s14, 2048  ;;  %p664_p11 = scmp.lt.s32.totalorder %s48_s14, %s48_s14 }
  0x1b   :  { %p660_p10 = scmp.ne.s32.totalorder %s48_s14, %s659_s1  ;;  %p665_p12 = scmp.lt.s32.totalorder %s659_s1, %s659_s1 }
  0x1d   :  { %p666_p13 = por %p665_p12, %p664_p11 }
  0x1f   :  { %p667_p0 = pnand %p666_p13, %p660_p10 }
  0x21   :  { %670 = shalt.err (!%p667_p0)
}
  0x22   :  { %53 = dma.hbm_to_vmem [thread:$0]  %s812_s3, 2048, %s48_s14, [#allocation7], %s721_s29, %s721_s29, %s722_s30  }
  0x23   :  { %s679_s0 = scalar_lea.vmem %s62_s16, 2048  ;;  %p684_p2 = scmp.lt.s32.totalorder %s62_s16, %s62_s16 }
  0x24   :  { %p680_p1 = scmp.ne.s32.totalorder %s62_s16, %s679_s0  ;;  %p685_p3 = scmp.lt.s32.totalorder %s679_s0, %s679_s0 }
  0x26   :  { %p686_p4 = por %p685_p3, %p684_p2 }
  0x28   :  { %p687_p5 = pnand %p686_p4, %p680_p1 }
  0x2a   :  { %690 = shalt.err (!%p687_p5)
}
  0x2b   :  { %67 = dma.hbm_to_vmem [thread:$0]  %s814_s5, 2048, %s62_s16, [#allocation10], %s721_s29, %s721_s29, %s722_s30  }
  0x2c   :  { %711 = dma.done.wait [#allocation4], 256  }
  0x2d   :  { %712 = vsyncadd [#allocation4], 4294967040 }
  0x2e   :  { %713 = dma.done.wait [#allocation7], 4096  }
  0x2f   :  { %714 = vsyncadd [#allocation7], 4294963200 }
  0x30   :  { %715 = dma.done.wait [#allocation10], 2048  }
  0x31   :  { %716 = vsyncadd [#allocation10], 4294965248  ;;  %v112_v0 = vld [vmem:[#allocation6 + $0x78] sm:$0xff]  ;;  %v111_v1 = vld [vmem:[#allocation6 + $0x70] sm:$0xff]  ;;  %s725_s24 = smov [#allocation11]  }
  0x32   :  { %491 = vmatprep.subr.mxu0 %v112_v0  ;;  %v110_v2 = vld [vmem:[#allocation6 + $0x68] sm:$0xff]  ;;  %v109_v3 = vld [vmem:[#allocation6 + $0x60] sm:$0xff]  ;;  %v790_v4 = vld [vmem:[#allocation3] sm:$0xff]  ;;  %s418_s25 = sshll.u32 %s725_s24, 4  ;;  %s419_s25 = int_to_ptr.vmem [resolvable:$true] %s418_s25 }
  0x33   :  { %492 = vmatpush3.msra.mxu0 %v112_v0  ;;  %v108_v5 = vld [vmem:[#allocation6 + $0x58] sm:$0xff]  ;;  %523 = vmatprep.mubr.f32.mxu0 %v790_v4  ;;  %v209_v7 = vld [vmem:[#allocation8 + $0x70] sm:$0xff]  ;;  %v208_v9 = vld [vmem:[#allocation8 + $0x68] sm:$0xff]  ;;  %p696_p7 = scmp.lt.s32.totalorder %s419_s25, %s419_s25 }
  0x34   :  { %493 = vmatprep.subr.mxu0 %v111_v1  ;;  %v210_v6 = vld [vmem:[#allocation8 + $0x78] sm:$0xff]  ;;  %v107_v8 = vld [vmem:[#allocation6 + $0x50] sm:$0xff]  ;;  %v106_v10 = vld [vmem:[#allocation6 + $0x48] sm:$0xff]  ;;  %558 = vmatprep.mubr.f32.mxu1 %v790_v4 }
  0x35   :  { %494 = vmatpush3.msra.mxu0 %v111_v1  ;;  %526 = vmatprep.subr.mxu1 %v210_v6  ;;  %v207_v11 = vld [vmem:[#allocation8 + $0x60] sm:$0xff]  ;;  %v206_v13 = vld [vmem:[#allocation8 + $0x58] sm:$0xff]  ;;  %v205_v15 = vld [vmem:[#allocation8 + $0x50] sm:$0xff] }
  0x36   :  { %495 = vmatprep.subr.mxu0 %v110_v2  ;;  %527 = vmatpush3.msra.mxu1 %v210_v6  ;;  %v105_v12 = vld [vmem:[#allocation6 + $0x40] sm:$0xff]  ;;  %v104_v14 = vld [vmem:[#allocation6 + $0x38] sm:$0xff]  ;;  %v103_v16 = vld [vmem:[#allocation6 + $0x30] sm:$0xff] }
  0x37   :  { %496 = vmatpush3.msra.mxu0 %v110_v2  ;;  %528 = vmatprep.subr.mxu1 %v209_v7  ;;  %v204_v17 = vld [vmem:[#allocation8 + $0x48] sm:$0xff]  ;;  %v203_v19 = vld [vmem:[#allocation8 + $0x40] sm:$0xff]  ;;  %v202_v21 = vld [vmem:[#allocation8 + $0x38] sm:$0xff] }
  0x38   :  { %497 = vmatprep.subr.mxu0 %v109_v3  ;;  %529 = vmatpush3.msra.mxu1 %v209_v7  ;;  %v102_v18 = vld [vmem:[#allocation6 + $0x28] sm:$0xff]  ;;  %v101_v20 = vld [vmem:[#allocation6 + $0x20] sm:$0xff]  ;;  %v100_v22 = vld [vmem:[#allocation6 + $0x18] sm:$0xff] }
  0x39   :  { %498 = vmatpush3.msra.mxu0 %v109_v3  ;;  %530 = vmatprep.subr.mxu1 %v208_v9  ;;  %v201_v23 = vld [vmem:[#allocation8 + $0x30] sm:$0xff]  ;;  %v200_v25 = vld [vmem:[#allocation8 + $0x28] sm:$0xff]  ;;  %v199_v27 = vld [vmem:[#allocation8 + $0x20] sm:$0xff] }
  0x3a   :  { %499 = vmatprep.subr.mxu0 %v108_v5  ;;  %531 = vmatpush3.msra.mxu1 %v208_v9  ;;  %v99_v24 = vld [vmem:[#allocation6 + $0x10] sm:$0xff]  ;;  %v98_v26 = vld [vmem:[#allocation6 + $0x8] sm:$0xff]  ;;  %v97_v28 = vld [vmem:[#allocation6] sm:$0xff] }
  0x3b   :  { %500 = vmatpush3.msra.mxu0 %v108_v5  ;;  %532 = vmatprep.subr.mxu1 %v207_v11  ;;  %v198_v29 = vld [vmem:[#allocation8 + $0x18] sm:$0xff]  ;;  %v197_v31 = vld [vmem:[#allocation8 + $0x10] sm:$0xff]  ;;  %v196_v32 = vld [vmem:[#allocation8 + $0x8] sm:$0xff] }
  0x3c   :  { %501 = vmatprep.subr.mxu0 %v107_v8  ;;  %533 = vmatpush3.msra.mxu1 %v207_v11  ;;  %v96_v30 = vld [vmem:[#allocation3 + $0x8] sm:$0xff]  ;;  %v195_v33 = vld [vmem:[#allocation8] sm:$0xff]  ;;  %v325_v35 = vld [vmem:[#allocation9 + $0x70] sm:$0xff] }
  0x3d   :  { %502 = vmatpush3.msra.mxu0 %v107_v8  ;;  %534 = vmatprep.subr.mxu1 %v206_v13  ;;  %v326_v34 = vld [vmem:[#allocation9 + $0x78] sm:$0xff]  ;;  %v324_v36 = vld [vmem:[#allocation9 + $0x68] sm:$0xff]  ;;  %v323_v37 = vld [vmem:[#allocation9 + $0x60] sm:$0xff] }
  0x3e   :  { %503 = vmatprep.subr.mxu0 %v106_v10  ;;  %535 = vmatpush3.msra.mxu1 %v206_v13  ;;  %v322_v38 = vld [vmem:[#allocation9 + $0x58] sm:$0xff]  ;;  %v321_v39 = vld [vmem:[#allocation9 + $0x50] sm:$0xff]  ;;  %v320_v40 = vld [vmem:[#allocation9 + $0x48] sm:$0xff] }
  0x3f   :  { %504 = vmatpush3.msra.mxu0 %v106_v10  ;;  %536 = vmatprep.subr.mxu1 %v205_v15  ;;  %v319_v41 = vld [vmem:[#allocation9 + $0x40] sm:$0xff]  ;;  %v318_v42 = vld [vmem:[#allocation9 + $0x38] sm:$0xff]  ;;  %v317_v43 = vld [vmem:[#allocation9 + $0x30] sm:$0xff] }
  0x40   :  { %505 = vmatprep.subr.mxu0 %v105_v12  ;;  %537 = vmatpush3.msra.mxu1 %v205_v15  ;;  %v316_v44 = vld [vmem:[#allocation9 + $0x28] sm:$0xff]  ;;  %v315_v45 = vld [vmem:[#allocation9 + $0x20] sm:$0xff]  ;;  %v314_v46 = vld [vmem:[#allocation9 + $0x18] sm:$0xff] }
  0x41   :  { %506 = vmatpush3.msra.mxu0 %v105_v12  ;;  %538 = vmatprep.subr.mxu1 %v204_v17  ;;  %v313_v47 = vld [vmem:[#allocation9 + $0x10] sm:$0xff]  ;;  %v312_v48 = vld [vmem:[#allocation9 + $0x8] sm:$0xff]  ;;  %v311_v49 = vld [vmem:[#allocation9] sm:$0xff] }
  0x42   :  { %507 = vmatprep.subr.mxu0 %v104_v14  ;;  %539 = vmatpush3.msra.mxu1 %v204_v17  ;;  %v433_v50 = vld [vmem:[%s811_s2] ss:$0 sm:$0xff] }
  0x43   :  { %508 = vmatpush3.msra.mxu0 %v104_v14  ;;  %540 = vmatprep.subr.mxu1 %v203_v19  ;;  %v434_v62 = vld [vmem:[%s813_s4] ss:$0 sm:$0xff]  ;;  %s691_s4 = scalar_lea.vmem %s419_s25, 256 }
  0x44   :  { %509 = vmatprep.subr.mxu0 %v103_v16  ;;  %541 = vmatpush3.msra.mxu1 %v203_v19  ;;  %v432_v8 = vld [vmem:[%s815_s6] ss:$0 sm:$0xff]  ;;  %p692_p6 = scmp.ne.s32.totalorder %s419_s25, %s691_s4  ;;  %p697_p8 = scmp.lt.s32.totalorder %s691_s4, %s691_s4 }
  0x45   :  { %510 = vmatpush3.msra.mxu0 %v103_v16  ;;  %542 = vmatprep.subr.mxu1 %v202_v21 }
  0x46   :  { %511 = vmatprep.subr.mxu0 %v102_v18  ;;  %543 = vmatpush3.msra.mxu1 %v202_v21  ;;  %p698_p9 = por %p697_p8, %p696_p7 }
  0x47   :  { %512 = vmatpush3.msra.mxu0 %v102_v18  ;;  %544 = vmatprep.subr.mxu1 %v201_v23 }
  0x48   :  { %513 = vmatprep.subr.mxu0 %v101_v20  ;;  %545 = vmatpush3.msra.mxu1 %v201_v23  ;;  %p699_p10 = pnand %p698_p9, %p692_p6 }
  0x49   :  { %514 = vmatpush3.msra.mxu0 %v101_v20  ;;  %546 = vmatprep.subr.mxu1 %v200_v25 }
  0x4a   :  { %515 = vmatprep.subr.mxu0 %v100_v22  ;;  %547 = vmatpush3.msra.mxu1 %v200_v25 }
  0x4b   :  { %516 = vmatpush3.msra.mxu0 %v100_v22  ;;  %548 = vmatprep.subr.mxu1 %v199_v27 }
  0x4c   :  { %517 = vmatprep.subr.mxu0 %v99_v24  ;;  %549 = vmatpush3.msra.mxu1 %v199_v27 }
  0x4d   :  { %518 = vmatpush3.msra.mxu0 %v99_v24  ;;  %550 = vmatprep.subr.mxu1 %v198_v29 }
  0x4e   :  { %519 = vmatprep.subr.mxu0 %v98_v26  ;;  %551 = vmatpush3.msra.mxu1 %v198_v29 }
  0x4f   :  { %520 = vmatpush3.msra.mxu0 %v98_v26  ;;  %552 = vmatprep.subr.mxu1 %v197_v31 }
  0x50   :  { %521 = vmatprep.subr.mxu0 %v97_v28  ;;  %553 = vmatpush3.msra.mxu1 %v197_v31 }
  0x51   :  { %522 = vmatpush3.msra.mxu0 %v97_v28  ;;  %554 = vmatprep.subr.mxu1 %v196_v32 }
  0x52   :  { %524 = vmatmul.mubr.f32.vlgmr.msra.gmra.mxu0 %v96_v30  ;;  %555 = vmatpush3.msra.mxu1 %v196_v32 }
  0x53   :  { %556 = vmatprep.subr.mxu1 %v195_v33  ;;  %561 = vmatprep.subr.mxu0 %v326_v34 }
  0x54   :  { %557 = vmatpush3.msra.mxu1 %v195_v33  ;;  %562 = vmatpush3.msra.mxu0 %v326_v34 }
  0x55   :  { %559 = vmatmul.mubr.f32.vlgmr.msra.gmra.mxu1 %v96_v30  ;;  %563 = vmatprep.subr.mxu0 %v325_v35 }
  0x56   :  { %564 = vmatpush3.msra.mxu0 %v325_v35 }
  0x57   :  { %565 = vmatprep.subr.mxu0 %v324_v36 }
  0x58   :  { %566 = vmatpush3.msra.mxu0 %v324_v36 }
  0x59   :  { %567 = vmatprep.subr.mxu0 %v323_v37 }
  0x5a   :  { %568 = vmatpush3.msra.mxu0 %v323_v37 }
  0x5b   :  { %569 = vmatprep.subr.mxu0 %v322_v38 }
  0x5c   :  { %570 = vmatpush3.msra.mxu0 %v322_v38 }
  0x5d   :  { %571 = vmatprep.subr.mxu0 %v321_v39 }
  0x5e   :  { %572 = vmatpush3.msra.mxu0 %v321_v39 }
  0x5f   :  { %573 = vmatprep.subr.mxu0 %v320_v40 }
  0x60   :  { %574 = vmatpush3.msra.mxu0 %v320_v40 }
  0x61   :  { %575 = vmatprep.subr.mxu0 %v319_v41 }
  0x62   :  { %576 = vmatpush3.msra.mxu0 %v319_v41 }
  0x63   :  { %577 = vmatprep.subr.mxu0 %v318_v42 }
  0x64   :  { %578 = vmatpush3.msra.mxu0 %v318_v42 }
  0x65   :  { %579 = vmatprep.subr.mxu0 %v317_v43 }
  0x66   :  { %580 = vmatpush3.msra.mxu0 %v317_v43 }
  0x67   :  { %581 = vmatprep.subr.mxu0 %v316_v44 }
  0x68   :  { %582 = vmatpush3.msra.mxu0 %v316_v44 }
  0x69   :  { %583 = vmatprep.subr.mxu0 %v315_v45 }
  0x6a   :  { %584 = vmatpush3.msra.mxu0 %v315_v45 }
  0x6b   :  { %585 = vmatprep.subr.mxu0 %v314_v46 }
  0x6c   :  { %586 = vmatpush3.msra.mxu0 %v314_v46 }
  0x6d   :  { %587 = vmatprep.subr.mxu0 %v313_v47 }
  0x6e   :  { %588 = vmatpush3.msra.mxu0 %v313_v47 }
  0x6f   :  { %589 = vmatprep.subr.mxu0 %v312_v48 }
  0x70   :  { %590 = vmatpush3.msra.mxu0 %v312_v48 }
  0x71   :  { %591 = vmatprep.subr.mxu0 %v311_v49 }
  0x72   :  { %592 = vmatpush3.msra.mxu0 %v311_v49 }
 0x112   :  { %v525_v51 = vpop.f32.mrf.mxu0 }
 0x113   :  { %v192_v52 = vadd.f32 %v525_v51, %v433_v50 }
 0x114   :  { %v186_v53 = vpop.f32.mrf.mxu0 }
 0x115   :  { %v436_v54 = vmul.f32 -1.442695, %v192_v52  ;;  %v187_v55 = vadd.f32 %v433_v50, %v186_v53  ;;  %v560_v61 = vpop.f32.mrf.mxu1 }
 0x116   :  { %v290_v3 = vadd.f32 %v560_v61, %v434_v62 }
 0x117   :  { %603 = vpow2.f32 %v436_v54  ;;  %v435_v56 = vmul.f32 -1.442695, %v187_v55  ;;  %v284_v0 = vpop.f32.mrf.mxu1 }
 0x118   :  { %v285_v5 = vadd.f32 %v434_v62, %v284_v0 }
 0x119   :  { %605 = vpow2.f32 %v435_v56 }
 0x124   :  { %v604_v57 = vpop.eup %603 }
 0x125   :  { %v300_v58 = vadd.f32 1.0, %v604_v57 }
 0x126   :  { %v606_v59 = vpop.eup %605 }
 0x127   :  { %607 = vrcp.f32 %v300_v58  ;;  %v299_v60 = vadd.f32 1.0, %v606_v59 }
 0x129   :  { %609 = vrcp.f32 %v299_v60 }
 0x134   :  { %v608_v63 = vpop.eup %607 }
 0x135   :  { %v306_v2 = vmul.f32 %v608_v63, %v192_v52 }
 0x136   :  { %v610_v1 = vpop.eup %609 }
 0x137   :  { %v305_v4 = vmul.f32 %v610_v1, %v187_v55  ;;  %v308_v7 = vmul.f32 %v306_v2, %v290_v3 }
 0x139   :  { %v307_v6 = vmul.f32 %v305_v4, %v285_v5 }
 0x13b   :  { %593 = vmatprep.mubr.f32.mxu0 %v307_v6 }
 0x13c   :  { %594 = vmatmul.mubr.f32.vlgmr.msra.gmra.mxu0 %v308_v7 }
 0x1fc   :  { %v595_v9 = vpop.f32.mrf.mxu0 }
 0x1fd   :  { %v403_v10 = vadd.f32 %v595_v9, %v432_v8 }
 0x1fe   :  { %v393_v11 = vpop.f32.mrf.mxu0 }
 0x1ff   :  { %412 = vst [vmem:[#allocation11 + $0x8] sm:$0xff] %v403_v10  ;;  %v402_v12 = vadd.f32 %v432_v8, %v393_v11 }
 0x201   :  { %411 = vst [vmem:[#allocation11] sm:$0xff] %v402_v12 }
 0x202   :  { %702 = shalt.err (!%p699_p10)
}
 0x203   :  { %424 = dma.vmem_to_hbm [thread:$0]  %s419_s25, 256, %s816_s7, [#allocation5], %s721_s29, %s721_s29, %s722_s30  }
 0x204   :  { %717 = dma.done.wait [#allocation5], 256  }
 0x205   :  { %718 = vsyncadd [#allocation5], 4294967040 }
 0x206   :  { %428 = vsyncpa [#allocation4], 1 }
 0x207   :  { %429 = vsyncpa [#allocation7], 1 }
 0x208   :  { %430 = vsyncpa [#allocation10], 1 }
 0x209   :  { %431 = vsyncpa [#allocation5], 1 }

</bundles_post_ra>
